<compile_context>
chip_gen: v7x
topology: tpu7x:2x2x1
jax: 0.10.0
libtpu: 0.0.40
codegen_flags: <defaults>
</compile_context>

<pallas_src>
import jax
import jax.numpy as jnp
from jax import lax
from jax.experimental import pallas as pl
from jax.experimental.pallas import tpu as pltpu

LANE = 128
SUBLANE = 8


def _round_up(n, m):
    return (n + m - 1) // m * m


def rnn_fc_kernel(x_ref, h0_ref, wih_ref, whh_ref, b_ref, wfc_ref, bfc_ref,
                  out_ref, hn_ref, hall_ref):
    """Single-layer Elman RNN (tanh) + Linear head, sublane/lane padded.

    x_ref   : (seq*BP, input_size)  time-major rows (row = t*BP + b), batch padded to BP
    h0_ref  : (BP, Hp)              hidden zero-padded to Hp (multiple of 128)
    wih_ref : (input_size, Hp)      (= W_ih^T, zero-padded cols)
    whh_ref : (Hp, Hp)              (= W_hh^T, zero-padded rows/cols)
    b_ref   : (1, Hp)               (= b_ih + b_hh, zero-padded)
    wfc_ref : (Hp, Op)              (= W_fc^T, zero-padded)
    bfc_ref : (1, Op)
    out_ref : (seq*BP, Op)          time-major per-timestep fc output (lane-dense)
    hn_ref  : (BP, Hp)              final hidden state
    hall_ref: (seq*BP, Hp)          VMEM scratch: staged hidden states for the FC head
    """
    bp = h0_ref.shape[0]                       # padded batch, multiple of 8
    seq = x_ref.shape[0] // bp
    input_size = x_ref.shape[1]

    # (1) Hoisted input projection + fused bias for ALL timesteps.
    #     input_size == 1 -> VPU broadcast multiply instead of a K=1 MXU matmul.
    if input_size == 1:
        pre_all = x_ref[...] * wih_ref[...] + b_ref[...]            # (seq*BP, Hp)
    else:
        pre_all = (jnp.dot(x_ref[...], wih_ref[...],
                           preferred_element_type=jnp.float32)
                   + b_ref[...])                                     # (seq*BP, Hp)

    # (2) Serial recurrence, statically unrolled; per step one matmul + tanh.
    #     Each per-step slice / store is a whole (8,128)-aligned tile.
    whh = whh_ref[...]                                               # load once
    h = h0_ref[...]                                                  # (BP, Hp)
    for t in range(seq):
        pre_t = pre_all[t * bp:(t + 1) * bp, :]                      # aligned static slice
        h = jnp.tanh(pre_t + jnp.dot(h, whh,
                                     preferred_element_type=jnp.float32))
        hall_ref[t * bp:(t + 1) * bp, :] = h                         # full-tile unmasked store
    hn_ref[...] = h

    # (3) FC head once over all timesteps; single lane-dense store.
    out_ref[...] = (jnp.dot(hall_ref[...], wfc_ref[...],
                            preferred_element_type=jnp.float32)
                    + bfc_ref[...])


def prepare_params(raw_params, input_size, hidden_dim, output_size):
    """Pre-transpose weights to (in, out), fold biases, zero-pad to lane width."""
    w_ih, w_hh, b_ih, b_hh, w_fc, b_fc = raw_params
    hp = _round_up(hidden_dim, LANE)
    op = _round_up(output_size, LANE)
    w_ih_p = jnp.zeros((input_size, hp), jnp.float32).at[:, :hidden_dim].set(w_ih.T)
    w_hh_p = jnp.zeros((hp, hp), jnp.float32).at[:hidden_dim, :hidden_dim].set(w_hh.T)
    b_p = jnp.zeros((1, hp), jnp.float32).at[0, :hidden_dim].set(b_ih + b_hh)
    w_fc_p = jnp.zeros((hp, op), jnp.float32).at[:hidden_dim, :output_size].set(w_fc.T)
    b_fc_p = jnp.zeros((1, op), jnp.float32).at[0, :output_size].set(b_fc)
    # Zero padding keeps padded hidden lanes at exactly 0 through tanh(0)=0.
    return (w_ih_p, w_hh_p, b_p, w_fc_p, b_fc_p)


def rnn_forward(x, h0, padded_params, hidden_dim, output_size):
    """x: (batch, seq, input_size) f32, h0: (1, batch, hidden_dim) f32.

    Returns (output, hidden) matching the PyTorch module:
      output: (batch*seq, output_size)
      hidden: (1, batch, hidden_dim)
    """
    w_ih_p, w_hh_p, b_p, w_fc_p, b_fc_p = padded_params
    batch, seq, input_size = x.shape
    hp = w_hh_p.shape[0]
    op = w_fc_p.shape[1]
    bp = _round_up(batch, SUBLANE)            # sublane-aligned batch

    # Time-major flatten of x with the batch axis zero-padded to BP (tiny, done once).
    x_tm = jnp.transpose(x, (1, 0, 2))                               # (seq, batch, in)
    x_tm = jnp.pad(x_tm, ((0, 0), (0, bp - batch), (0, 0)))          # (seq, BP, in)
    x_tm = x_tm.reshape(seq * bp, input_size)
    # Zero-pad h0 on both the batch (sublane) and hidden (lane) axes.
    h0_p = jnp.zeros((bp, hp), jnp.float32).at[:batch, :hidden_dim].set(h0[0])

    vmem = pl.BlockSpec(memory_space=pltpu.MemorySpace.VMEM)

    out_tm, h_n = pl.pallas_call(
        rnn_fc_kernel,
        out_shape=(
            jax.ShapeDtypeStruct((seq * bp, op), jnp.float32),
            jax.ShapeDtypeStruct((bp, hp), jnp.float32),
        ),
        in_specs=[vmem] * 7,
        out_specs=(vmem, vmem),
        scratch_shapes=[pltpu.VMEM((seq * bp, hp), jnp.float32)],
    )(x_tm, h0_p, w_ih_p, w_hh_p, b_p, w_fc_p, b_fc_p)

    # Drop padded batch rows / padded lanes and reorder time-major -> batch-major
    # flatten (== r_out.view(-1, hidden_dim) ordering of the PyTorch module).
    output = (out_tm.reshape(seq, bp, op)[:, :batch, :output_size]
              .transpose(1, 0, 2)
              .reshape(batch * seq, output_size))
    hidden = h_n[:batch, :hidden_dim][None]                          # (1, batch, H)
    return output, hidden


if __name__ == "__main__":
    input_size = 1
    hidden_dim = 30
    output_size = 1
    n_layers = 1
    batch = 2
    seq = 8

    key = jax.random.PRNGKey(0)
    kx, kh, kp = jax.random.split(key, 3)

    # Sine-wave style input, like the reference script (batch_first layout).
    t = jnp.linspace(0.0, jnp.pi, seq)
    x = jnp.broadcast_to(jnp.sin(t)[None, :, None],
                         (batch, seq, input_size)).astype(jnp.float32)
    x = x + 0.01 * jax.random.normal(kx, x.shape, jnp.float32)

    h0 = jax.random.normal(kh, (n_layers, batch, hidden_dim), jnp.float32)

    # PyTorch-like U(-1/sqrt(H), 1/sqrt(H)) init at logical sizes.
    k = 1.0 / jnp.sqrt(jnp.float32(hidden_dim))
    keys = jax.random.split(kp, 6)
    w_ih = jax.random.uniform(keys[0], (hidden_dim, input_size), jnp.float32, -k, k)
    w_hh = jax.random.uniform(keys[1], (hidden_dim, hidden_dim), jnp.float32, -k, k)
    b_ih = jax.random.uniform(keys[2], (hidden_dim,), jnp.float32, -k, k)
    b_hh = jax.random.uniform(keys[3], (hidden_dim,), jnp.float32, -k, k)
    w_fc = jax.random.uniform(keys[4], (output_size, hidden_dim), jnp.float32, -k, k)
    b_fc = jax.random.uniform(keys[5], (output_size,), jnp.float32, -k, k)
    raw_params = (w_ih, w_hh, b_ih, b_hh, w_fc, b_fc)

    padded_params = prepare_params(raw_params, input_size, hidden_dim, output_size)

    output, hidden = rnn_forward(x, h0, padded_params, hidden_dim, output_size)
    jax.block_until_ready((output, hidden))

    assert output.shape == (batch * seq, output_size)
    assert hidden.shape == (n_layers, batch, hidden_dim)

    # Pure-JAX reference check (unpadded weights).
    def ref_step(h, x_t):
        h_new = jnp.tanh(x_t @ w_ih.T + h @ w_hh.T + b_ih + b_hh)
        return h_new, h_new

    h_last, r_out = lax.scan(ref_step, h0[0], jnp.transpose(x, (1, 0, 2)))
    ref_out = (jnp.transpose(r_out, (1, 0, 2)).reshape(-1, hidden_dim) @ w_fc.T + b_fc)
    assert jnp.allclose(output, ref_out, atol=1e-5, rtol=1e-5)
    assert jnp.allclose(hidden[0], h_last, atol=1e-5, rtol=1e-5)

    print("KERNEL_OK")
</pallas_src>

<mosaic_0001>
module attributes {stable_mosaic.version = 11 : i64} {
  func.func @rnn_fc_kernel(%arg0: memref<64x1xf32, #tpu.memory_space<vmem>>, %arg1: memref<8x128xf32, #tpu.memory_space<vmem>>, %arg2: memref<1x128xf32, #tpu.memory_space<vmem>>, %arg3: memref<128x128xf32, #tpu.memory_space<vmem>>, %arg4: memref<1x128xf32, #tpu.memory_space<vmem>>, %arg5: memref<128x128xf32, #tpu.memory_space<vmem>>, %arg6: memref<1x128xf32, #tpu.memory_space<vmem>>, %arg7: memref<64x128xf32, #tpu.memory_space<vmem>>, %arg8: memref<8x128xf32, #tpu.memory_space<vmem>>, %arg9: memref<64x128xf32, #tpu.memory_space<vmem>>) attributes {dimension_semantics = [], scalar_prefetch = 0 : i64, scratch_operands = 1 : i64, tpu.core_type = #tpu.core_type<tc>} {
    %c0 = arith.constant 0 : index
    %c0_0 = arith.constant 0 : index
    %0 = vector.load %arg0[%c0, %c0_0] : memref<64x1xf32, #tpu.memory_space<vmem>>, vector<64x1xf32>
    %c0_1 = arith.constant 0 : index
    %c0_2 = arith.constant 0 : index
    %1 = vector.load %arg2[%c0_1, %c0_2] : memref<1x128xf32, #tpu.memory_space<vmem>>, vector<1x128xf32>
    %2 = vector.broadcast %0 : vector<64x1xf32> to vector<64x128xf32>
    %3 = vector.broadcast %1 : vector<1x128xf32> to vector<64x128xf32>
    %4 = arith.mulf %2, %3 : vector<64x128xf32>
    %c0_3 = arith.constant 0 : index
    %c0_4 = arith.constant 0 : index
    %5 = vector.load %arg4[%c0_3, %c0_4] : memref<1x128xf32, #tpu.memory_space<vmem>>, vector<1x128xf32>
    %6 = vector.broadcast %5 : vector<1x128xf32> to vector<64x128xf32>
    %7 = arith.addf %4, %6 : vector<64x128xf32>
    %c0_5 = arith.constant 0 : index
    %c0_6 = arith.constant 0 : index
    %8 = vector.load %arg3[%c0_5, %c0_6] : memref<128x128xf32, #tpu.memory_space<vmem>>, vector<128x128xf32>
    %c0_7 = arith.constant 0 : index
    %c0_8 = arith.constant 0 : index
    %9 = vector.load %arg1[%c0_7, %c0_8] : memref<8x128xf32, #tpu.memory_space<vmem>>, vector<8x128xf32>
    %10 = vector.extract_strided_slice %7 {offsets = [0, 0], sizes = [8, 128], strides = [1, 1]} : vector<64x128xf32> to vector<8x128xf32>
    %cst = arith.constant dense<0.000000e+00> : vector<8x128xf32>
    %11 = tpu.matmul %9, %8, %cst {dimension_numbers = #tpu.dot_dimension_numbers<[1], [0], [0], [1], [0, 0, 1, 1], [], []>} : vector<8x128xf32>, vector<128x128xf32>, vector<8x128xf32> -> vector<8x128xf32>
    %12 = arith.addf %10, %11 : vector<8x128xf32>
    %13 = math.tanh %12 : vector<8x128xf32>
    %c0_9 = arith.constant 0 : index
    %c0_10 = arith.constant 0 : index
    %14 = vector.load %arg9[%c0_9, %c0_10] : memref<64x128xf32, #tpu.memory_space<vmem>>, vector<8x128xf32>
    tpu.vector_store %arg9[%c0_9, %c0_10], %13 {strides = array<i32>} : memref<64x128xf32, #tpu.memory_space<vmem>>, vector<8x128xf32>,
    %15 = vector.extract_strided_slice %7 {offsets = [8, 0], sizes = [8, 128], strides = [1, 1]} : vector<64x128xf32> to vector<8x128xf32>
    %cst_11 = arith.constant dense<0.000000e+00> : vector<8x128xf32>
    %16 = tpu.matmul %13, %8, %cst_11 {dimension_numbers = #tpu.dot_dimension_numbers<[1], [0], [0], [1], [0, 0, 1, 1], [], []>} : vector<8x128xf32>, vector<128x128xf32>, vector<8x128xf32> -> vector<8x128xf32>
    %17 = arith.addf %15, %16 : vector<8x128xf32>
    %18 = math.tanh %17 : vector<8x128xf32>
    %c8 = arith.constant 8 : index
    %c0_12 = arith.constant 0 : index
    %19 = vector.load %arg9[%c8, %c0_12] : memref<64x128xf32, #tpu.memory_space<vmem>>, vector<8x128xf32>
    tpu.vector_store %arg9[%c8, %c0_12], %18 {strides = array<i32>} : memref<64x128xf32, #tpu.memory_space<vmem>>, vector<8x128xf32>,
    %20 = vector.extract_strided_slice %7 {offsets = [16, 0], sizes = [8, 128], strides = [1, 1]} : vector<64x128xf32> to vector<8x128xf32>
    %cst_13 = arith.constant dense<0.000000e+00> : vector<8x128xf32>
    %21 = tpu.matmul %18, %8, %cst_13 {dimension_numbers = #tpu.dot_dimension_numbers<[1], [0], [0], [1], [0, 0, 1, 1], [], []>} : vector<8x128xf32>, vector<128x128xf32>, vector<8x128xf32> -> vector<8x128xf32>
    %22 = arith.addf %20, %21 : vector<8x128xf32>
    %23 = math.tanh %22 : vector<8x128xf32>
    %c16 = arith.constant 16 : index
    %c0_14 = arith.constant 0 : index
    %24 = vector.load %arg9[%c16, %c0_14] : memref<64x128xf32, #tpu.memory_space<vmem>>, vector<8x128xf32>
    tpu.vector_store %arg9[%c16, %c0_14], %23 {strides = array<i32>} : memref<64x128xf32, #tpu.memory_space<vmem>>, vector<8x128xf32>,
    %25 = vector.extract_strided_slice %7 {offsets = [24, 0], sizes = [8, 128], strides = [1, 1]} : vector<64x128xf32> to vector<8x128xf32>
    %cst_15 = arith.constant dense<0.000000e+00> : vector<8x128xf32>
    %26 = tpu.matmul %23, %8, %cst_15 {dimension_numbers = #tpu.dot_dimension_numbers<[1], [0], [0], [1], [0, 0, 1, 1], [], []>} : vector<8x128xf32>, vector<128x128xf32>, vector<8x128xf32> -> vector<8x128xf32>
    %27 = arith.addf %25, %26 : vector<8x128xf32>
    %28 = math.tanh %27 : vector<8x128xf32>
    %c24 = arith.constant 24 : index
    %c0_16 = arith.constant 0 : index
    %29 = vector.load %arg9[%c24, %c0_16] : memref<64x128xf32, #tpu.memory_space<vmem>>, vector<8x128xf32>
    tpu.vector_store %arg9[%c24, %c0_16], %28 {strides = array<i32>} : memref<64x128xf32, #tpu.memory_space<vmem>>, vector<8x128xf32>,
    %30 = vector.extract_strided_slice %7 {offsets = [32, 0], sizes = [8, 128], strides = [1, 1]} : vector<64x128xf32> to vector<8x128xf32>
    %cst_17 = arith.constant dense<0.000000e+00> : vector<8x128xf32>
    %31 = tpu.matmul %28, %8, %cst_17 {dimension_numbers = #tpu.dot_dimension_numbers<[1], [0], [0], [1], [0, 0, 1, 1], [], []>} : vector<8x128xf32>, vector<128x128xf32>, vector<8x128xf32> -> vector<8x128xf32>
    %32 = arith.addf %30, %31 : vector<8x128xf32>
    %33 = math.tanh %32 : vector<8x128xf32>
    %c32 = arith.constant 32 : index
    %c0_18 = arith.constant 0 : index
    %34 = vector.load %arg9[%c32, %c0_18] : memref<64x128xf32, #tpu.memory_space<vmem>>, vector<8x128xf32>
    tpu.vector_store %arg9[%c32, %c0_18], %33 {strides = array<i32>} : memref<64x128xf32, #tpu.memory_space<vmem>>, vector<8x128xf32>,
    %35 = vector.extract_strided_slice %7 {offsets = [40, 0], sizes = [8, 128], strides = [1, 1]} : vector<64x128xf32> to vector<8x128xf32>
    %cst_19 = arith.constant dense<0.000000e+00> : vector<8x128xf32>
    %36 = tpu.matmul %33, %8, %cst_19 {dimension_numbers = #tpu.dot_dimension_numbers<[1], [0], [0], [1], [0, 0, 1, 1], [], []>} : vector<8x128xf32>, vector<128x128xf32>, vector<8x128xf32> -> vector<8x128xf32>
    %37 = arith.addf %35, %36 : vector<8x128xf32>
    %38 = math.tanh %37 : vector<8x128xf32>
    %c40 = arith.constant 40 : index
    %c0_20 = arith.constant 0 : index
    %39 = vector.load %arg9[%c40, %c0_20] : memref<64x128xf32, #tpu.memory_space<vmem>>, vector<8x128xf32>
    tpu.vector_store %arg9[%c40, %c0_20], %38 {strides = array<i32>} : memref<64x128xf32, #tpu.memory_space<vmem>>, vector<8x128xf32>,
    %40 = vector.extract_strided_slice %7 {offsets = [48, 0], sizes = [8, 128], strides = [1, 1]} : vector<64x128xf32> to vector<8x128xf32>
    %cst_21 = arith.constant dense<0.000000e+00> : vector<8x128xf32>
    %41 = tpu.matmul %38, %8, %cst_21 {dimension_numbers = #tpu.dot_dimension_numbers<[1], [0], [0], [1], [0, 0, 1, 1], [], []>} : vector<8x128xf32>, vector<128x128xf32>, vector<8x128xf32> -> vector<8x128xf32>
    %42 = arith.addf %40, %41 : vector<8x128xf32>
    %43 = math.tanh %42 : vector<8x128xf32>
    %c48 = arith.constant 48 : index
    %c0_22 = arith.constant 0 : index
    %44 = vector.load %arg9[%c48, %c0_22] : memref<64x128xf32, #tpu.memory_space<vmem>>, vector<8x128xf32>
    tpu.vector_store %arg9[%c48, %c0_22], %43 {strides = array<i32>} : memref<64x128xf32, #tpu.memory_space<vmem>>, vector<8x128xf32>,
    %45 = vector.extract_strided_slice %7 {offsets = [56, 0], sizes = [8, 128], strides = [1, 1]} : vector<64x128xf32> to vector<8x128xf32>
    %cst_23 = arith.constant dense<0.000000e+00> : vector<8x128xf32>
    %46 = tpu.matmul %43, %8, %cst_23 {dimension_numbers = #tpu.dot_dimension_numbers<[1], [0], [0], [1], [0, 0, 1, 1], [], []>} : vector<8x128xf32>, vector<128x128xf32>, vector<8x128xf32> -> vector<8x128xf32>
    %47 = arith.addf %45, %46 : vector<8x128xf32>
    %48 = math.tanh %47 : vector<8x128xf32>
    %c56 = arith.constant 56 : index
    %c0_24 = arith.constant 0 : index
    %49 = vector.load %arg9[%c56, %c0_24] : memref<64x128xf32, #tpu.memory_space<vmem>>, vector<8x128xf32>
    tpu.vector_store %arg9[%c56, %c0_24], %48 {strides = array<i32>} : memref<64x128xf32, #tpu.memory_space<vmem>>, vector<8x128xf32>,
    %c0_25 = arith.constant 0 : index
    %c0_26 = arith.constant 0 : index
    %50 = vector.load %arg8[%c0_25, %c0_26] : memref<8x128xf32, #tpu.memory_space<vmem>>, vector<8x128xf32>
    tpu.vector_store %arg8[%c0_25, %c0_26], %48 {strides = array<i32>} : memref<8x128xf32, #tpu.memory_space<vmem>>, vector<8x128xf32>,
    %c0_27 = arith.constant 0 : index
    %c0_28 = arith.constant 0 : index
    %51 = vector.load %arg9[%c0_27, %c0_28] : memref<64x128xf32, #tpu.memory_space<vmem>>, vector<64x128xf32>
    %c0_29 = arith.constant 0 : index
    %c0_30 = arith.constant 0 : index
    %52 = vector.load %arg5[%c0_29, %c0_30] : memref<128x128xf32, #tpu.memory_space<vmem>>, vector<128x128xf32>
    %cst_31 = arith.constant dense<0.000000e+00> : vector<64x128xf32>
    %53 = tpu.matmul %51, %52, %cst_31 {dimension_numbers = #tpu.dot_dimension_numbers<[1], [0], [0], [1], [0, 0, 1, 1], [], []>} : vector<64x128xf32>, vector<128x128xf32>, vector<64x128xf32> -> vector<64x128xf32>
    %c0_32 = arith.constant 0 : index
    %c0_33 = arith.constant 0 : index
    %54 = vector.load %arg6[%c0_32, %c0_33] : memref<1x128xf32, #tpu.memory_space<vmem>>, vector<1x128xf32>
    %55 = vector.broadcast %54 : vector<1x128xf32> to vector<64x128xf32>
    %56 = arith.addf %53, %55 : vector<64x128xf32>
    %c0_34 = arith.constant 0 : index
    %c0_35 = arith.constant 0 : index
    %57 = vector.load %arg7[%c0_34, %c0_35] : memref<64x128xf32, #tpu.memory_space<vmem>>, vector<64x128xf32>
    tpu.vector_store %arg7[%c0_34, %c0_35], %56 {strides = array<i32>} : memref<64x128xf32, #tpu.memory_space<vmem>>, vector<64x128xf32>,
    return
  }
}

</mosaic_0001>

<bundles_post_ra>
// kernel: tpu_custom_call.1
= control target key start
LH: loop header
LB: loop body
LE: loop exit
PB: predicated region body
PF: predicated region fallthrough
CT: control target
= control target key end

     0   :  { %14 = vsyncpa [#allocation4], 0  ;;  %s2097_s0 = inlined_call_operand.vmem [shape: f32[64,1], index: 0, kind: input, shape index: {}]   ;;  %s2098_s1 = inlined_call_operand.vmem [shape: f32[8,128], index: 1, kind: input, shape index: {}]   ;;  %s2099_s2 = inlined_call_operand.vmem [shape: f32[1,128], index: 2, kind: input, shape index: {}]   ;;  %s2100_s3 = inlined_call_operand.hbm [shape: f32[128,128], index: 3, kind: input, shape index: {}]   ;;  %s2101_s4 = inlined_call_operand.vmem [shape: f32[1,128], index: 4, kind: input, shape index: {}]   ;;  %s2102_s5 = inlined_call_operand.hbm [shape: f32[128,128], index: 5, kind: input, shape index: {}]   ;;  %s2103_s6 = inlined_call_operand.vmem [shape: f32[1,128], index: 6, kind: input, shape index: {}]   ;;  %s2104_s7 = inlined_call_operand.hbm [shape: f32[64,128], index: 7, kind: output, shape index: {0}]   ;;  %s2105_s8 = inlined_call_operand.hbm [shape: f32[8,128], index: 8, kind: output, shape index: {1}]  }
   0x1   :  { %15 = vsyncpa [#allocation7], 0 }
   0x2   :  { %16 = vsyncpa [#allocation5], 0 }
   0x3   :  { %17 = vsyncpa [#allocation10], 0  ;;  %s1749_s27 = smov [#allocation3]   ;;  %s1653_s9 = scalar_lea.hbm %s2100_s3, 2048 }
   0x4   :  { %s29_s28 = sshll.u32 %s1749_s27, 4  ;;  %p1654_p0 = scmp.ne.s32.totalorder %s2100_s3, %s1653_s9  ;;  %s30_s28 = int_to_ptr.vmem [resolvable:$true] %s29_s28 }
   0x5   :  { %p1657_p1 = scmp.lt.u32.totalorder %s1653_s9, %s2100_s3 }
   0x7   :  { %p1659_p2 = pnand %p1657_p1, %p1654_p0 }
   0x9   :  { %1662 = shalt.err (!%p1659_p2)
}
   0xa   :  { %s1663_s14 = scalar_lea.vmem %s30_s28, 2048  ;;  %p1668_p4 = scmp.lt.s32.totalorder %s30_s28, %s30_s28 }
   0xb   :  { %p1664_p3 = scmp.ne.s32.totalorder %s30_s28, %s1663_s14  ;;  %p1669_p5 = scmp.lt.s32.totalorder %s1663_s14, %s1663_s14 }
   0xd   :  { %p1670_p6 = por %p1669_p5, %p1668_p4 }
   0xf   :  { %p1671_p7 = pnand %p1670_p6, %p1664_p3 }
  0x11   :  { %1674 = shalt.err (!%p1671_p7)
}
  0x12   :  { %s1750_s15 = smov 128   ;;  %s1751_s16 = smov 8  }
  0x13   :  { %35 = dma.hbm_to_vmem [thread:$0]  %s2100_s3, 2048, %s30_s28, [#allocation4], %s1750_s15, %s1750_s15, %s1751_s16  }
  0x14   :  { %s1752_s19 = smov [#allocation6]   ;;  %s1675_s23 = scalar_lea.hbm %s2102_s5, 2048 }
  0x15   :  { %s43_s20 = sshll.u32 %s1752_s19, 4  ;;  %p1676_p8 = scmp.ne.s32.totalorder %s2102_s5, %s1675_s23  ;;  %s44_s20 = int_to_ptr.vmem [resolvable:$true] %s43_s20 }
  0x16   :  { %p1679_p9 = scmp.lt.u32.totalorder %s1675_s23, %s2102_s5 }
  0x18   :  { %p1681_p10 = pnand %p1679_p9, %p1676_p8 }
  0x1a   :  { %1684 = shalt.err (!%p1681_p10)
}
  0x1b   :  { %s1685_s29 = scalar_lea.vmem %s44_s20, 2048  ;;  %p1690_p12 = scmp.lt.s32.totalorder %s44_s20, %s44_s20 }
  0x1c   :  { %p1686_p11 = scmp.ne.s32.totalorder %s44_s20, %s1685_s29  ;;  %p1691_p13 = scmp.lt.s32.totalorder %s1685_s29, %s1685_s29 }
  0x1e   :  { %p1692_p0 = por %p1691_p13, %p1690_p12 }
  0x20   :  { %p1693_p1 = pnand %p1692_p0, %p1686_p11 }
  0x22   :  { %1696 = shalt.err (!%p1693_p1)
}
  0x23   :  { %49 = dma.hbm_to_vmem [thread:$0]  %s2102_s5, 2048, %s44_s20, [#allocation7], %s1750_s15, %s1750_s15, %s1751_s16  }
  0x24   :  { %1741 = dma.done.wait [#allocation4], 2048  }
  0x25   :  { %1742 = vsyncadd [#allocation4], 4294965248 }
  0x26   :  { %1743 = dma.done.wait [#allocation7], 2048  }
  0x27   :  { %1744 = vsyncadd [#allocation7], 4294965248  ;;  %v1753_v0 = vmov 0.0|0.0   ;;  %vm1754_vm0 = vmmov 0   ;;  %v1755_v1 = vmov 0.0   ;;  %v1756_v2 = vmov 0  }
  0x28   :  { %1401 = vmatprep.subr.bf16.mxu1 %v1753_v0  ;;  %1109 = vmatprep.mubr.msk.f32.mxu1 %vm1754_vm0, %v1755_v1  ;;  %v136_v3 = vld [vmem:[#allocation3] sm:$0xff]  ;;  %v137_v4 = vld [vmem:[#allocation3 + $0x8] sm:$0xff]  ;;  %v138_v5 = vld [vmem:[#allocation3 + $0x10] sm:$0xff] }
  0x29   :  { %1635 = vset.pattern.permute.xlu0 %v1756_v2  ;;  %1449 = vmatprep.subr.bf16.mxu0 %v1753_v0  ;;  %v1840_v6 = vpack.c.bf16 %v137_v4, %v136_v3  ;;  %v139_v7 = vld [vmem:[#allocation3 + $0x18] sm:$0xff]  ;;  %v140_v9 = vld [vmem:[#allocation3 + $0x20] sm:$0xff]  ;;  %v141_v10 = vld [vmem:[#allocation3 + $0x28] sm:$0xff] }
  0x2a   :  { %1179 = vmatprep.mubr.msk.f32.mxu0 %vm1754_vm0, %v1755_v1  ;;  %1636 = vset.pattern.permute.xlu1 %v1756_v2  ;;  %v1843_v8 = vpack.c.bf16 %v139_v7, %v138_v5  ;;  %v58_v11 = vld [vmem:[%s2097_s0] sm:$0xff]  ;;  %v1852_v12 = vpack.c.bf16 %v141_v10, %v140_v9  ;;  %v59_v13 = vld [vmem:[%s2097_s0 + $0x8] sm:$0xff]  ;;  %v142_v14 = vld [vmem:[#allocation3 + $0x30] sm:$0xff] }
  0x2b   :  { %1403 = vmatpush3.bf16.msra.mxu1 %v1840_v6  ;;  %1451 = vmatpush3.bf16.msra.mxu0 %v1840_v6  ;;  %v143_v15 = vld [vmem:[#allocation3 + $0x38] sm:$0xff]  ;;  %v62_v17 = vld [vmem:[%s2097_s0 + $0x20] sm:$0xff]  ;;  %v145_v19 = vld [vmem:[#allocation3 + $0x48] sm:$0xff] }
  0x2c   :  { %1404 = vmatprep.subr.bf16.mxu1 %v1753_v0  ;;  %1452 = vmatprep.subr.bf16.mxu0 %v1753_v0  ;;  %v1861_v16 = vpack.c.bf16 %v143_v15, %v142_v14  ;;  %v144_v18 = vld [vmem:[#allocation3 + $0x40] sm:$0xff]  ;;  %v64_v21 = vld [vmem:[%s2097_s0 + $0x30] sm:$0xff]  ;;  %v147_v23 = vld [vmem:[#allocation3 + $0x58] sm:$0xff] }
  0x2d   :  { %69 = vperm.xlu0 %1635, %v58_v11   ;;  %v1870_v20 = vpack.c.bf16 %v145_v19, %v144_v18  ;;  %v146_v22 = vld [vmem:[#allocation3 + $0x50] sm:$0xff]  ;;  %v148_v25 = vld [vmem:[#allocation3 + $0x60] sm:$0xff]  ;;  %v149_v26 = vld [vmem:[#allocation3 + $0x68] sm:$0xff] }
  0x2e   :  { %v1879_v24 = vpack.c.bf16 %v147_v23, %v146_v22  ;;  %v1885_v27 = vpack.c.bf16 %v149_v26, %v148_v25  ;;  %v150_v28 = vld [vmem:[#allocation3 + $0x70] sm:$0xff]  ;;  %v151_v29 = vld [vmem:[#allocation3 + $0x78] sm:$0xff]  ;;  %v152_v31 = vld [vmem:[%s2098_s1] sm:$0xff] }
  0x2f   :  { %1406 = vmatpush3.bf16.msra.mxu1 %v1843_v8  ;;  %1454 = vmatpush3.bf16.msra.mxu0 %v1843_v8  ;;  %v1891_v30 = vpack.c.bf16 %v151_v29, %v150_v28  ;;  %v1924_v32 = vld [vmem:[%s2099_s2] ss:$0 sm:$0xff]  ;;  %v60_v41 = vld [vmem:[%s2097_s0 + $0x10] sm:$0xff]  ;;  %v61_v42 = vld [vmem:[%s2097_s0 + $0x18] sm:$0xff] }
  0x30   :  { %1407 = vmatprep.subr.bf16.mxu1 %v1753_v0  ;;  %1455 = vmatprep.subr.bf16.mxu0 %v1753_v0  ;;  %v1930_v35 = vld [vmem:[%s2101_s4] ss:$0 sm:$0xff]  ;;  %v63_v43 = vld [vmem:[%s2097_s0 + $0x28] sm:$0xff]  ;;  %v65_v44 = vld [vmem:[%s2097_s0 + $0x38] sm:$0xff] }
  0x31   :  { %74 = vperm.xlu0 %1635, %v59_v13   ;;  %79 = vperm.xlu1 %1636, %v60_v41   ;;  %v748_v19 = vld [vmem:[#allocation6 + $0x10] sm:$0xff]  ;;  %v751_v23 = vld [vmem:[#allocation6 + $0x28] sm:$0xff]  ;;  %v753_v26 = vld [vmem:[#allocation6 + $0x38] sm:$0xff] }
  0x32   :  { %v752_v25 = vld [vmem:[#allocation6 + $0x30] sm:$0xff]  ;;  %v754_v28 = vld [vmem:[#allocation6 + $0x40] sm:$0xff]  ;;  %v755_v29 = vld [vmem:[#allocation6 + $0x48] sm:$0xff] }
  0x33   :  { %1409 = vmatpush3.bf16.msra.mxu1 %v1852_v12  ;;  %1457 = vmatpush3.bf16.msra.mxu0 %v1852_v12 }
  0x34   :  { %1410 = vmatprep.subr.bf16.mxu1 %v1753_v0  ;;  %1458 = vmatprep.subr.bf16.mxu0 %v1753_v0 }
  0x35   :  { %89 = vperm.xlu0 %1635, %v62_v17   ;;  %84 = vperm.xlu1 %1636, %v61_v42  }
  0x37   :  { %1412 = vmatpush3.bf16.msra.mxu1 %v1861_v16  ;;  %1460 = vmatpush3.bf16.msra.mxu0 %v1861_v16 }
  0x38   :  { %1413 = vmatprep.subr.bf16.mxu1 %v1753_v0  ;;  %1461 = vmatprep.subr.bf16.mxu0 %v1753_v0 }
  0x39   :  { %99 = vperm.xlu0 %1635, %v64_v21   ;;  %94 = vperm.xlu1 %1636, %v63_v43  }
  0x3b   :  { %1415 = vmatpush3.bf16.msra.mxu1 %v1870_v20  ;;  %1463 = vmatpush3.bf16.msra.mxu0 %v1870_v20 }
  0x3c   :  { %1416 = vmatprep.subr.bf16.mxu1 %v1753_v0  ;;  %1464 = vmatprep.subr.bf16.mxu0 %v1753_v0 }
  0x3d   :  { %104 = vperm.xlu1 %1636, %v65_v44  }
  0x3f   :  { %1418 = vmatpush3.bf16.msra.mxu1 %v1879_v24  ;;  %1466 = vmatpush3.bf16.msra.mxu0 %v1879_v24 }
  0x40   :  { %1419 = vmatprep.subr.bf16.mxu1 %v1753_v0  ;;  %1467 = vmatprep.subr.bf16.mxu0 %v1753_v0 }
  0x43   :  { %1421 = vmatpush3.bf16.msra.mxu1 %v1885_v27  ;;  %1469 = vmatpush3.bf16.msra.mxu0 %v1885_v27 }
  0x44   :  { %1422 = vmatprep.subr.bf16.mxu1 %v1753_v0  ;;  %1470 = vmatprep.subr.bf16.mxu0 %v1753_v0 }
  0x47   :  { %1424 = vmatpush3.bf16.msra.mxu1 %v1891_v30  ;;  %1472 = vmatpush3.bf16.msra.mxu0 %v1891_v30 }
  0x48   :  { %1425 = vmatprep.subr.bf16.mxu1 %v1753_v0  ;;  %1497 = vmatprep.subr.bf16.mxu0 %v1753_v0 }
  0x4a   :  { %1110 = vmatmul.mubr.f32.vlgmr.msra.gmra.mrb[0].mxu1 %v152_v31  ;;  %v756_v31 = vld [vmem:[#allocation6 + $0x50] sm:$0xff] }
  0x4b   :  { %1427 = vmatpush3.bf16.msra.mxu1 %v1840_v6  ;;  %1144 = vmatprep.mubr.msk.f32.mxu1 %vm1754_vm0, %v1755_v1 }
  0x4c   :  { %1428 = vmatprep.subr.bf16.mxu1 %v1753_v0 }
  0x4f   :  { %1430 = vmatpush3.bf16.msra.mxu1 %v1843_v8 }
  0x50   :  { %1431 = vmatprep.subr.bf16.mxu1 %v1753_v0 }
  0x53   :  { %1433 = vmatpush3.bf16.msra.mxu1 %v1852_v12 }
  0x54   :  { %1434 = vmatprep.subr.bf16.mxu1 %v1753_v0 }
  0x57   :  { %1436 = vmatpush3.bf16.msra.mxu1 %v1861_v16 }
  0x58   :  { %1437 = vmatprep.subr.bf16.mxu1 %v1753_v0 }
  0x5b   :  { %1439 = vmatpush3.bf16.msra.mxu1 %v1870_v20 }
  0x5c   :  { %1440 = vmatprep.subr.bf16.mxu1 %v1753_v0 }
  0x5f   :  { %1442 = vmatpush3.bf16.msra.mxu1 %v1879_v24 }
  0x60   :  { %1443 = vmatprep.subr.bf16.mxu1 %v1753_v0 }
  0x63   :  { %1445 = vmatpush3.bf16.msra.mxu1 %v1885_v27 }
  0x64   :  { %1446 = vmatprep.subr.bf16.mxu1 %v1753_v0 }
  0x67   :  { %1448 = vmatpush3.bf16.msra.mxu1 %v1891_v30 }
  0x68   :  { %1473 = vmatprep.subr.bf16.mxu1 %v1753_v0 }
  0xac   :  { %v70_v33 = vpop.permute.xlu0 %69 }
  0xad   :  { %v113_v34 = vmul.f32 %v1924_v32, %v70_v33  ;;  %v757_v33 = vld [vmem:[#allocation6 + $0x58] sm:$0xff] }
  0xaf   :  { %v128_v36 = vadd.f32 %v1930_v35, %v113_v34  ;;  %v1613_v34 = vpack.c.bf16 %v757_v33, %v756_v31 }
  0xb0   :  { %v75_v45 = vpop.permute.xlu0 %74  ;;  %v80_v52 = vpop.permute.xlu1 %79 }
  0xb1   :  { %v114_v46 = vmul.f32 %v1924_v32, %v75_v45  ;;  %v115_v53 = vmul.f32 %v1924_v32, %v80_v52 }
  0xb3   :  { %v129_v47 = vadd.f32 %v1930_v35, %v114_v46  ;;  %v130_v54 = vadd.f32 %v1930_v35, %v115_v53 }
  0xb4   :  { %v85_v59 = vpop.permute.xlu1 %84  ;;  %v90_v4 = vpop.permute.xlu0 %89 }
  0xb5   :  { %v116_v60 = vmul.f32 %v1924_v32, %v85_v59  ;;  %v117_v5 = vmul.f32 %v1924_v32, %v90_v4 }
  0xb7   :  { %v131_v61 = vadd.f32 %v1930_v35, %v116_v60  ;;  %v132_v7 = vadd.f32 %v1930_v35, %v117_v5 }
  0xb8   :  { %v100_v42 = vpop.permute.xlu0 %99 }
  0xb9   :  { %v119_v43 = vmul.f32 %v1924_v32, %v100_v42 }
  0xbb   :  { %v134_v44 = vadd.f32 %v1930_v35, %v119_v43 }
 0x11d   :  { %v219_v37 = vpop.f32.mrb[0].mxu1 }
 0x11e   :  { %v223_v38 = vadd.f32 %v219_v37, %v128_v36  ;;  %v1111_v39 = vpop.f32.mrb[1].mxu1  ;;  %v758_v36 = vld [vmem:[#allocation6 + $0x60] sm:$0xff]  ;;  %v759_v37 = vld [vmem:[#allocation6 + $0x68] sm:$0xff] }
 0x11f   :  { %v760_v39 = vld [vmem:[#allocation6 + $0x70] sm:$0xff] }
 0x120   :  { %1637 = vtanh.f32 %v223_v38  ;;  %v1617_v38 = vpack.c.bf16 %v759_v37, %v758_v36 }
 0x12a   :  { %v1933_v40 = vpop.eup %1637 }
 0x12b   :  { %1145 = vmatmul.mubr.f32.vlgmr.msra.gmra.mrb[2].mxu1 %v1933_v40 }
 0x12c   :  { %1475 = vmatpush3.bf16.msra.mxu1 %v1840_v6  ;;  %1214 = vmatprep.mubr.msk.f32.mxu1 %vm1754_vm0, %v1755_v1 }
 0x12d   :  { %1476 = vmatprep.subr.bf16.mxu1 %v1753_v0 }
 0x130   :  { %1478 = vmatpush3.bf16.msra.mxu1 %v1843_v8 }
 0x131   :  { %1479 = vmatprep.subr.bf16.mxu1 %v1753_v0 }
 0x134   :  { %1481 = vmatpush3.bf16.msra.mxu1 %v1852_v12 }
 0x135   :  { %1482 = vmatprep.subr.bf16.mxu1 %v1753_v0 }
 0x138   :  { %1484 = vmatpush3.bf16.msra.mxu1 %v1861_v16 }
 0x139   :  { %1485 = vmatprep.subr.bf16.mxu1 %v1753_v0 }
 0x13c   :  { %1487 = vmatpush3.bf16.msra.mxu1 %v1870_v20 }
 0x13d   :  { %1488 = vmatprep.subr.bf16.mxu1 %v1753_v0 }
 0x140   :  { %1490 = vmatpush3.bf16.msra.mxu1 %v1879_v24 }
 0x141   :  { %1491 = vmatprep.subr.bf16.mxu1 %v1753_v0 }
 0x144   :  { %1493 = vmatpush3.bf16.msra.mxu1 %v1885_v27 }
 0x145   :  { %1494 = vmatprep.subr.bf16.mxu1 %v1753_v0 }
 0x148   :  { %1496 = vmatpush3.bf16.msra.mxu1 %v1891_v30 }
 0x149   :  { %1521 = vmatprep.subr.bf16.mxu1 %v1753_v0 }
 0x1fe   :  { %v292_v48 = vpop.f32.mrb[2].mxu1 }
 0x1ff   :  { %v296_v49 = vadd.f32 %v292_v48, %v129_v47  ;;  %v1146_v50 = vpop.f32.mrb[3].mxu1 }
 0x201   :  { %1639 = vtanh.f32 %v296_v49  ;;  %v916_v49 = vld [vmem:[%s2103_s6] ss:$0 sm:$0xff]  ;;  %s1757_s6 = smov [#allocation9]  }
 0x202   :  { %s900_s3 = sshll.u32 %s1757_s6, 4  ;;  %s901_s3 = int_to_ptr.vmem [resolvable:$true] %s900_s3 }
 0x203   :  { %s1697_s28 = scalar_lea.vmem %s901_s3, 128  ;;  %p1702_p3 = scmp.lt.s32.totalorder %s901_s3, %s901_s3 }
 0x204   :  { %p1698_p2 = scmp.ne.s32.totalorder %s901_s3, %s1697_s28  ;;  %p1703_p4 = scmp.lt.s32.totalorder %s1697_s28, %s1697_s28 }
 0x206   :  { %p1704_p5 = por %p1703_p4, %p1702_p3 }
 0x208   :  { %p1705_p6 = pnand %p1704_p5, %p1698_p2 }
 0x20b   :  { %v1968_v51 = vpop.eup %1639 }
 0x20c   :  { %1180 = vmatmul.mubr.f32.vlgmr.msra.gmra.mrb[0].mxu0 %v1968_v51 }
 0x20d   :  { %1499 = vmatpush3.bf16.msra.mxu0 %v1840_v6  ;;  %1249 = vmatprep.mubr.msk.f32.mxu0 %vm1754_vm0, %v1755_v1 }
 0x20e   :  { %1500 = vmatprep.subr.bf16.mxu0 %v1753_v0 }
 0x211   :  { %1502 = vmatpush3.bf16.msra.mxu0 %v1843_v8 }
 0x212   :  { %1503 = vmatprep.subr.bf16.mxu0 %v1753_v0 }
 0x215   :  { %1505 = vmatpush3.bf16.msra.mxu0 %v1852_v12 }
 0x216   :  { %1506 = vmatprep.subr.bf16.mxu0 %v1753_v0 }
 0x219   :  { %1508 = vmatpush3.bf16.msra.mxu0 %v1861_v16 }
 0x21a   :  { %1509 = vmatprep.subr.bf16.mxu0 %v1753_v0 }
 0x21d   :  { %1511 = vmatpush3.bf16.msra.mxu0 %v1870_v20 }
 0x21e   :  { %1512 = vmatprep.subr.bf16.mxu0 %v1753_v0 }
 0x221   :  { %1514 = vmatpush3.bf16.msra.mxu0 %v1879_v24 }
 0x222   :  { %1515 = vmatprep.subr.bf16.mxu0 %v1753_v0 }
 0x225   :  { %1517 = vmatpush3.bf16.msra.mxu0 %v1885_v27 }
 0x226   :  { %1518 = vmatprep.subr.bf16.mxu0 %v1753_v0 }
 0x229   :  { %1520 = vmatpush3.bf16.msra.mxu0 %v1891_v30 }
 0x22a   :  { %1545 = vmatprep.subr.bf16.mxu0 %v1753_v0 }
 0x2df   :  { %v365_v55 = vpop.f32.mrb[0].mxu0 }
 0x2e0   :  { %v369_v56 = vadd.f32 %v365_v55, %v130_v54  ;;  %v1181_v57 = vpop.f32.mrb[1].mxu0 }
 0x2e2   :  { %1641 = vtanh.f32 %v369_v56 }
 0x2ec   :  { %v1991_v58 = vpop.eup %1641 }
 0x2ed   :  { %1215 = vmatmul.mubr.f32.vlgmr.msra.gmra.mrb[4].mxu1 %v1991_v58 }
 0x2ee   :  { %1523 = vmatpush3.bf16.msra.mxu1 %v1840_v6  ;;  %1284 = vmatprep.mubr.msk.f32.mxu1 %vm1754_vm0, %v1755_v1 }
 0x2ef   :  { %1524 = vmatprep.subr.bf16.mxu1 %v1753_v0 }
 0x2f2   :  { %1526 = vmatpush3.bf16.msra.mxu1 %v1843_v8 }
 0x2f3   :  { %1527 = vmatprep.subr.bf16.mxu1 %v1753_v0 }
 0x2f6   :  { %1529 = vmatpush3.bf16.msra.mxu1 %v1852_v12 }
 0x2f7   :  { %1530 = vmatprep.subr.bf16.mxu1 %v1753_v0 }
 0x2fa   :  { %1532 = vmatpush3.bf16.msra.mxu1 %v1861_v16 }
 0x2fb   :  { %1533 = vmatprep.subr.bf16.mxu1 %v1753_v0 }
 0x2fe   :  { %1535 = vmatpush3.bf16.msra.mxu1 %v1870_v20 }
 0x2ff   :  { %1536 = vmatprep.subr.bf16.mxu1 %v1753_v0 }
 0x302   :  { %1538 = vmatpush3.bf16.msra.mxu1 %v1879_v24 }
 0x303   :  { %1539 = vmatprep.subr.bf16.mxu1 %v1753_v0 }
 0x306   :  { %1541 = vmatpush3.bf16.msra.mxu1 %v1885_v27 }
 0x307   :  { %1542 = vmatprep.subr.bf16.mxu1 %v1753_v0 }
 0x30a   :  { %1544 = vmatpush3.bf16.msra.mxu1 %v1891_v30 }
 0x30b   :  { %1569 = vmatprep.subr.bf16.mxu1 %v1753_v0 }
 0x3c0   :  { %v438_v62 = vpop.f32.mrb[4].mxu1 }
 0x3c1   :  { %v442_v63 = vadd.f32 %v438_v62, %v131_v61  ;;  %v1216_v2 = vpop.f32.mrb[5].mxu1 }
 0x3c3   :  { %1643 = vtanh.f32 %v442_v63 }
 0x3cd   :  { %v2014_v3 = vpop.eup %1643 }
 0x3ce   :  { %1250 = vmatmul.mubr.f32.vlgmr.msra.gmra.mrb[2].mxu0 %v2014_v3 }
 0x3cf   :  { %1547 = vmatpush3.bf16.msra.mxu0 %v1840_v6  ;;  %1319 = vmatprep.mubr.msk.f32.mxu0 %vm1754_vm0, %v1755_v1 }
 0x3d0   :  { %1548 = vmatprep.subr.bf16.mxu0 %v1753_v0 }
 0x3d3   :  { %1550 = vmatpush3.bf16.msra.mxu0 %v1843_v8 }
 0x3d4   :  { %1551 = vmatprep.subr.bf16.mxu0 %v1753_v0 }
 0x3d7   :  { %1553 = vmatpush3.bf16.msra.mxu0 %v1852_v12 }
 0x3d8   :  { %1554 = vmatprep.subr.bf16.mxu0 %v1753_v0 }
 0x3db   :  { %1556 = vmatpush3.bf16.msra.mxu0 %v1861_v16 }
 0x3dc   :  { %1557 = vmatprep.subr.bf16.mxu0 %v1753_v0 }
 0x3df   :  { %1559 = vmatpush3.bf16.msra.mxu0 %v1870_v20 }
 0x3e0   :  { %1560 = vmatprep.subr.bf16.mxu0 %v1753_v0 }
 0x3e3   :  { %1562 = vmatpush3.bf16.msra.mxu0 %v1879_v24 }
 0x3e4   :  { %1563 = vmatprep.subr.bf16.mxu0 %v1753_v0 }
 0x3e7   :  { %1565 = vmatpush3.bf16.msra.mxu0 %v1885_v27 }
 0x3e8   :  { %1566 = vmatprep.subr.bf16.mxu0 %v1753_v0 }
 0x3eb   :  { %1568 = vmatpush3.bf16.msra.mxu0 %v1891_v30 }
 0x4a1   :  { %v511_v9 = vpop.f32.mrb[2].mxu0 }
 0x4a2   :  { %v515_v10 = vadd.f32 %v511_v9, %v132_v7  ;;  %v1251_v11 = vpop.f32.mrb[3].mxu0 }
 0x4a4   :  { %1645 = vtanh.f32 %v515_v10 }
 0x4ae   :  { %v2036_v13 = vpop.eup %1645 }
 0x4af   :  { %1285 = vmatmul.mubr.f32.vlgmr.msra.gmra.mrb[6].mxu1 %v2036_v13 }
 0x4b0   :  { %1571 = vmatpush3.bf16.msra.mxu1 %v1840_v6  ;;  %1354 = vmatprep.mubr.msk.f32.mxu1 %vm1754_vm0, %v1755_v1  ;;  %v746_v1 = vld [vmem:[#allocation6] sm:$0xff]  ;;  %v747_v6 = vld [vmem:[#allocation6 + $0x8] sm:$0xff] }
 0x4b1   :  { %1572 = vmatprep.subr.bf16.mxu1 %v1753_v0 }
 0x4b4   :  { %1574 = vmatpush3.bf16.msra.mxu1 %v1843_v8  ;;  %v1593_v8 = vpack.c.bf16 %v747_v6, %v746_v1 }
 0x4b5   :  { %1575 = vmatprep.subr.bf16.mxu1 %v1753_v0 }
 0x4b6   :  { %1594 = vmatprep.subr.bf16.mxu0 %v1593_v8 }
 0x4b8   :  { %1577 = vmatpush3.bf16.msra.mxu1 %v1852_v12  ;;  %v95_v12 = vpop.permute.xlu1 %94 }
 0x4b9   :  { %1578 = vmatprep.subr.bf16.mxu1 %v1753_v0  ;;  %v118_v14 = vmul.f32 %v1924_v32, %v95_v12 }
 0x4bb   :  { %v133_v15 = vadd.f32 %v1930_v35, %v118_v14 }
 0x4bc   :  { %1580 = vmatpush3.bf16.msra.mxu1 %v1861_v16  ;;  %v105_v62 = vpop.permute.xlu1 %104 }
 0x4bd   :  { %1581 = vmatprep.subr.bf16.mxu1 %v1753_v0  ;;  %v120_v63 = vmul.f32 %v1924_v32, %v105_v62 }
 0x4bf   :  { %v135_v2 = vadd.f32 %v1930_v35, %v120_v63 }
 0x4c0   :  { %1583 = vmatpush3.bf16.msra.mxu1 %v1870_v20  ;;  %v749_v20 = vld [vmem:[#allocation6 + $0x18] sm:$0xff] }
 0x4c1   :  { %1584 = vmatprep.subr.bf16.mxu1 %v1753_v0  ;;  %v1597_v21 = vpack.c.bf16 %v749_v20, %v748_v19 }
 0x4c4   :  { %1586 = vmatpush3.bf16.msra.mxu1 %v1879_v24 }
 0x4c5   :  { %1587 = vmatprep.subr.bf16.mxu1 %v1753_v0 }
 0x4c8   :  { %1589 = vmatpush3.bf16.msra.mxu1 %v1885_v27  ;;  %v1605_v27 = vpack.c.bf16 %v753_v26, %v752_v25 }
 0x4c9   :  { %1590 = vmatprep.subr.bf16.mxu1 %v1753_v0  ;;  %v750_v0 = vld [vmem:[#allocation6 + $0x20] sm:$0xff] }
 0x4ca   :  { %v1601_v24 = vpack.c.bf16 %v751_v23, %v750_v0 }
 0x4cc   :  { %1592 = vmatpush3.bf16.msra.mxu1 %v1891_v30  ;;  %v1609_v30 = vpack.c.bf16 %v755_v29, %v754_v28 }
 0x582   :  { %v584_v16 = vpop.f32.mrb[6].mxu1 }
 0x583   :  { %v588_v17 = vadd.f32 %v584_v16, %v133_v15  ;;  %v1286_v18 = vpop.f32.mrb[7].mxu1 }
 0x585   :  { %1647 = vtanh.f32 %v588_v17 }
 0x58f   :  { %v1648_v22 = vpop.eup %1647 }
 0x590   :  { %1320 = vmatmul.mubr.f32.vlgmr.msra.gmra.mrb[4].mxu0 %v1648_v22 }
 0x591   :  { %1596 = vmatpush3.bf16.msra.mxu0 %v1593_v8  ;;  %1389 = vmatprep.mubr.f32.mxu0 %v1933_v40  ;;  %v761_v40 = vld [vmem:[#allocation6 + $0x78] sm:$0xff] }
 0x592   :  { %1598 = vmatprep.subr.bf16.mxu0 %v1597_v21  ;;  %v1621_v41 = vpack.c.bf16 %v761_v40, %v760_v39 }
 0x595   :  { %1600 = vmatpush3.bf16.msra.mxu0 %v1597_v21 }
 0x596   :  { %1602 = vmatprep.subr.bf16.mxu0 %v1601_v24 }
 0x599   :  { %1604 = vmatpush3.bf16.msra.mxu0 %v1601_v24 }
 0x59a   :  { %1606 = vmatprep.subr.bf16.mxu0 %v1605_v27 }
 0x59d   :  { %1608 = vmatpush3.bf16.msra.mxu0 %v1605_v27 }
 0x59e   :  { %1610 = vmatprep.subr.bf16.mxu0 %v1609_v30 }
 0x5a1   :  { %1612 = vmatpush3.bf16.msra.mxu0 %v1609_v30 }
 0x5a2   :  { %1614 = vmatprep.subr.bf16.mxu0 %v1613_v34 }
 0x5a5   :  { %1616 = vmatpush3.bf16.msra.mxu0 %v1613_v34 }
 0x5a6   :  { %1618 = vmatprep.subr.bf16.mxu0 %v1617_v38 }
 0x5a9   :  { %1620 = vmatpush3.bf16.msra.mxu0 %v1617_v38 }
 0x5aa   :  { %1622 = vmatprep.subr.bf16.mxu0 %v1621_v41 }
 0x5ad   :  { %1624 = vmatpush3.bf16.msra.mxu0 %v1621_v41 }
 0x5b0   :  { %1390 = vmatmul.mubr.f32.vlgmr.msra.gmra.mrb[6].mxu0 %v1968_v51 }
 0x5b1   :  { %1392 = vmatprep.mubr.f32.mxu0 %v1991_v58 }
 0x5b4   :  { %1393 = vmatmul.mubr.f32.gmra.mrb[8].mxu0 %v2014_v3 }
 0x5b5   :  { %1395 = vmatprep.mubr.f32.mxu0 %v2036_v13 }
 0x5b8   :  { %1396 = vmatmul.mubr.f32.gmra.mrb[10].mxu0 %v1648_v22 }
 0x663   :  { %v657_v45 = vpop.f32.mrb[4].mxu0 }
 0x664   :  { %v661_v46 = vadd.f32 %v657_v45, %v134_v44  ;;  %v1321_v47 = vpop.f32.mrb[5].mxu0 }
 0x666   :  { %1649 = vtanh.f32 %v661_v46 }
 0x670   :  { %v1650_v48 = vpop.eup %1649 }
 0x671   :  { %1355 = vmatmul.mubr.f32.vlgmr.msra.gmra.mrb[8].mxu1 %v1650_v48  ;;  %1398 = vmatprep.mubr.f32.mxu0 %v1650_v48 }
 0x683   :  { %v1391_v50 = vpop.f32.mrb[6].mxu0 }
 0x684   :  { %v841_v51 = vadd.f32 %v1391_v50, %v916_v49  ;;  %v835_v52 = vpop.f32.mrb[7].mxu0 }
 0x685   :  { %v836_v53 = vadd.f32 %v916_v49, %v835_v52 }
 0x686   :  { %875 = vst [vmem:[#allocation8 + $0x8] sm:$0xff] %v841_v51 }
 0x687   :  { %874 = vst [vmem:[#allocation8] sm:$0xff] %v836_v53  ;;  %v1394_v54 = vpop.f32.mrb[8].mxu0 }
 0x688   :  { %v851_v55 = vadd.f32 %v1394_v54, %v916_v49  ;;  %v845_v56 = vpop.f32.mrb[9].mxu0 }
 0x689   :  { %v846_v57 = vadd.f32 %v916_v49, %v845_v56 }
 0x68a   :  { %877 = vst [vmem:[#allocation8 + $0x18] sm:$0xff] %v851_v55 }
 0x68b   :  { %876 = vst [vmem:[#allocation8 + $0x10] sm:$0xff] %v846_v57  ;;  %v1397_v58 = vpop.f32.mrb[10].mxu0 }
 0x68c   :  { %v861_v59 = vadd.f32 %v1397_v58, %v916_v49  ;;  %v855_v60 = vpop.f32.mrb[11].mxu0 }
 0x68d   :  { %v856_v61 = vadd.f32 %v916_v49, %v855_v60 }
 0x68e   :  { %879 = vst [vmem:[#allocation8 + $0x28] sm:$0xff] %v861_v59 }
 0x68f   :  { %878 = vst [vmem:[#allocation8 + $0x20] sm:$0xff] %v856_v61 }
 0x744   :  { %v730_v3 = vpop.f32.mrb[8].mxu1 }
 0x745   :  { %v734_v4 = vadd.f32 %v730_v3, %v135_v2  ;;  %v1356_v5 = vpop.f32.mrb[9].mxu1 }
 0x747   :  { %1651 = vtanh.f32 %v734_v4 }
 0x751   :  { %v1652_v7 = vpop.eup %1651 }
 0x752   :  { %737 = vst [vmem:[#allocation9] sm:$0xff] %v1652_v7  ;;  %1399 = vmatmul.mubr.f32.gmra.mrb[12].mxu0 %v1652_v7 }
 0x753   :  { %1708 = shalt.err (!%p1705_p6)
}
 0x754   :  { %s1709_s9 = scalar_lea.hbm %s2105_s8, 128 }
 0x755   :  { %p1710_p7 = scmp.ne.s32.totalorder %s2105_s8, %s1709_s9  ;;  %p1713_p8 = scmp.lt.u32.totalorder %s1709_s9, %s2105_s8 }
 0x757   :  { %p1715_p9 = pnand %p1713_p8, %p1710_p7 }
 0x759   :  { %1718 = shalt.err (!%p1715_p9)
}
 0x75a   :  { %903 = dma.vmem_to_hbm [thread:$0]  %s901_s3, 128, %s2105_s8, [#allocation10]  }
 0x75b   :  { %s1758_s18 = smov [#allocation8]  }
 0x75c   :  { %s887_s1 = sshll.u32 %s1758_s18, 4  ;;  %s888_s1 = int_to_ptr.vmem [resolvable:$true] %s887_s1 }
 0x75d   :  { %s1719_s19 = scalar_lea.vmem %s888_s1, 1024  ;;  %p1724_p11 = scmp.lt.s32.totalorder %s888_s1, %s888_s1 }
 0x75e   :  { %p1720_p10 = scmp.ne.s32.totalorder %s888_s1, %s1719_s19  ;;  %p1725_p12 = scmp.lt.s32.totalorder %s1719_s19, %s1719_s19 }
 0x760   :  { %p1726_p13 = por %p1725_p12, %p1724_p11 }
 0x762   :  { %p1727_p0 = pnand %p1726_p13, %p1720_p10 }
 0x825   :  { %v1400_v32 = vpop.f32.mrb[12].mxu0 }
 0x826   :  { %v871_v35 = vadd.f32 %v1400_v32, %v916_v49  ;;  %v865_v9 = vpop.f32.mrb[13].mxu0 }
 0x827   :  { %v866_v10 = vadd.f32 %v916_v49, %v865_v9 }
 0x828   :  { %881 = vst [vmem:[#allocation8 + $0x38] sm:$0xff] %v871_v35 }
 0x829   :  { %880 = vst [vmem:[#allocation8 + $0x30] sm:$0xff] %v866_v10 }
 0x82a   :  { %1730 = shalt.err (!%p1727_p0)
}
 0x82b   :  { %s1731_s8 = scalar_lea.hbm %s2104_s7, 1024 }
 0x82c   :  { %p1732_p1 = scmp.ne.s32.totalorder %s2104_s7, %s1731_s8  ;;  %p1735_p2 = scmp.lt.u32.totalorder %s1731_s8, %s2104_s7 }
 0x82e   :  { %p1737_p3 = pnand %p1735_p2, %p1732_p1 }
 0x830   :  { %1740 = shalt.err (!%p1737_p3)
}
 0x831   :  { %893 = dma.vmem_to_hbm [thread:$0]  %s888_s1, 1024, %s2104_s7, [#allocation5], %s1750_s15, %s1750_s15, %s1751_s16  }
 0x832   :  { %1745 = dma.done.wait [#allocation5], 1024  }
 0x833   :  { %1746 = vsyncadd [#allocation5], 4294966272 }
 0x834   :  { %1747 = dma.done.wait [#allocation10], 128  }
 0x835   :  { %1748 = vsyncadd [#allocation10], 4294967168 }
 0x836   :  { %910 = vsyncpa [#allocation4], 1 }
 0x837   :  { %911 = vsyncpa [#allocation7], 1 }
 0x838   :  { %912 = vsyncpa [#allocation5], 1 }
 0x839   :  { %913 = vsyncpa [#allocation10], 1 }

</bundles_post_ra>
